<compile_context>
chip_gen: v7x
topology: tpu7x:2x2x1
jax: 0.10.0
libtpu: 0.0.40
codegen_flags: <defaults>
</compile_context>

<pallas_src>
import jax
import jax.numpy as jnp
from jax.experimental import pallas as pl
from jax.experimental.pallas import tpu as pltpu


def _policy_kernel(scale_ref, x_ref, w1_ref, b1_ref, w2_ref, b2_ref, o_ref):
    max_action = scale_ref[0]                                   # SMEM scalar
    w1 = w1_ref[...]
    w2 = w2_ref[...]
    # Layer 1: Linear + ReLU (MXU matmul, f32 accumulation; VPU add/max)
    h = jnp.dot(x_ref[...], w1, preferred_element_type=jnp.float32)
    h = jnp.maximum(h + b1_ref[...], 0.0)
    # Layer 2: Linear + tanh * max_action (MXU matmul, EUP tanh)
    a = jnp.dot(h.astype(w2.dtype), w2, preferred_element_type=jnp.float32)
    o_ref[...] = (max_action * jnp.tanh(a + b2_ref[...])).astype(o_ref.dtype)


def _block_diag(w, n):
    """(k, m) -> (n*k, n*m) block-diagonal with n copies of w on the diagonal."""
    k, m = w.shape
    eye = jnp.eye(n, dtype=w.dtype)
    return (eye[:, None, :, None] * w[None, :, None, :]).reshape(n * k, n * m)


def policy_forward(x, w1, b1, w2, b2, max_action, *,
                   tile_samples=32768, use_bf16=False):
    """x: (B, state_dim); w1: (state_dim, hidden); b1: (1, hidden);
    w2: (hidden, action_dim); b2: (1, action_dim); max_action: scalar.
    Weights are stored transposed vs. PyTorch nn.Linear (in, out)."""
    batch, state_dim = x.shape
    hidden = w1.shape[1]
    action_dim = w2.shape[1]

    # --- sample packing factor: fill the 128 lanes of the layer-2 output ---
    pack = 128 // action_dim if 128 % action_dim == 0 else 1
    # Guard: don't let the block-diagonal weights blow up for large features.
    while pack > 1 and pack * pack * state_dim * hidden * 4 > (8 << 20):
        pack //= 2

    # Pad the batch to a multiple of `pack` (zeros: benign through relu/tanh,
    # sliced off at the end), then pack `pack` samples per lane row.
    bpad = (-batch) % pack
    if bpad:
        x = jnp.pad(x, ((0, bpad), (0, 0)))
    bp = batch + bpad
    rows = bp // pack

    xp = x.reshape(rows, pack * state_dim)                # free reshape
    w1p = _block_diag(w1, pack)                           # (pack*S, pack*H)
    w2p = _block_diag(w2, pack)                           # (pack*H, pack*A)
    b1p = jnp.tile(b1.reshape(1, hidden), (1, pack))      # (1, pack*H)
    b2p = jnp.tile(b2.reshape(1, action_dim), (1, pack))  # (1, pack*A)

    in_dtype = jnp.bfloat16 if use_bf16 else jnp.float32
    xp = xp.astype(in_dtype)
    w1p = w1p.astype(in_dtype)
    w2p = w2p.astype(in_dtype)
    b1p = b1p.astype(jnp.float32)
    b2p = b2p.astype(jnp.float32)

    kx = pack * state_dim
    kh = pack * hidden
    ka = pack * action_dim

    # --- batch (packed-row) tile selection ---
    # Target >= a few MB of x per grid step; sublane tile must be a multiple
    # of 8 unless it equals the full extent.  When there is enough work, cap
    # at ~half the rows so the grid has >=2 steps for v7x's two TensorCores.
    tile_r_target = max(8, (max(tile_samples, pack) // pack) // 8 * 8)
    if rows <= 8:
        tile_r = rows
    else:
        half = ((pl.cdiv(rows, 2) + 7) // 8) * 8
        tile_r = min(tile_r_target, half)
    grid = (pl.cdiv(rows, tile_r),)

    scale = jnp.asarray(max_action, dtype=jnp.float32).reshape(1)

    out_packed = pl.pallas_call(
        _policy_kernel,
        out_shape=jax.ShapeDtypeStruct((rows, ka), jnp.float32),
        grid=grid,
        in_specs=[
            # runtime scalar -> SMEM (no recompile when max_action changes)
            pl.BlockSpec(memory_space=pltpu.MemorySpace.SMEM),
            # x: tiled over packed rows, pipelined
            pl.BlockSpec((tile_r, kx), lambda i: (i, 0)),
            # packed weights / biases: same block every step -> VMEM-resident
            pl.BlockSpec((kx, kh), lambda i: (0, 0)),
            pl.BlockSpec((1, kh), lambda i: (0, 0)),
            pl.BlockSpec((kh, ka), lambda i: (0, 0)),
            pl.BlockSpec((1, ka), lambda i: (0, 0)),
        ],
        # lane-dense output slab: ka is a multiple of 128 (or full extent)
        out_specs=pl.BlockSpec((tile_r, ka), lambda i: (i, 0)),
        compiler_params=pltpu.CompilerParams(
            # batch axis is independent -> shard across both TCs on v7x
            dimension_semantics=("parallel",),
            # explicit budget: > v5e's 16 MiB default, < v7x's 64 MiB physical
            vmem_limit_bytes=40 * 1024 * 1024,
        ),
    )(scale, xp, w1p, b1p, w2p, b2p)

    out = out_packed.reshape(bp, action_dim)              # free reshape back
    if bpad:
        out = out[:batch]
    return out


def init_policy_params(key, state_dim, action_dim, hidden_size):
    """Deterministic synthetic init (uniform, like PyTorch's default scale)."""
    k1, k2, k3, k4 = jax.random.split(key, 4)
    lim1 = 1.0 / jnp.sqrt(state_dim)
    lim2 = 1.0 / jnp.sqrt(hidden_size)
    w1 = jax.random.uniform(k1, (state_dim, hidden_size), jnp.float32, -lim1, lim1)
    b1 = jax.random.uniform(k2, (1, hidden_size), jnp.float32, -lim1, lim1)
    w2 = jax.random.uniform(k3, (hidden_size, action_dim), jnp.float32, -lim2, lim2)
    b2 = jax.random.uniform(k4, (1, action_dim), jnp.float32, -lim2, lim2)
    return w1, b1, w2, b2


def _reference(x, w1, b1, w2, b2, max_action):
    h = jnp.maximum(x @ w1 + b1, 0.0)
    return max_action * jnp.tanh(h @ w2 + b2)


if __name__ == "__main__":
    # Shapes consistent with the module: batch=2, state_dim=16,
    # hidden_size=32, action_dim=8, max_action=2.0
    batch, state_dim, hidden_size, action_dim = 2, 16, 32, 8
    max_action = 2.0

    key = jax.random.PRNGKey(0)
    kx, kp = jax.random.split(key)
    x = jax.random.normal(kx, (batch, state_dim), dtype=jnp.float32)
    w1, b1, w2, b2 = init_policy_params(kp, state_dim, action_dim, hidden_size)

    # 1) Small batch (single packed row, single grid step).
    out = jax.block_until_ready(policy_forward(x, w1, b1, w2, b2, max_action))
    ref = _reference(x, w1, b1, w2, b2, max_action)
    assert out.shape == (batch, action_dim)
    assert jnp.allclose(out, ref, atol=1e-5, rtol=1e-5)

    # 2) Multi-step tiled grid with a partial last block
    #    (300 samples -> pad to 304 -> 19 packed rows -> tile_r=8 -> 3 steps).
    x2 = jax.random.normal(jax.random.PRNGKey(1), (300, state_dim), dtype=jnp.float32)
    out2 = jax.block_until_ready(
        policy_forward(x2, w1, b1, w2, b2, max_action, tile_samples=128))
    ref2 = _reference(x2, w1, b1, w2, b2, max_action)
    assert out2.shape == (300, state_dim and action_dim)
    assert jnp.allclose(out2, ref2, atol=1e-5, rtol=1e-5)

    # 3) Larger batch exercising the 2-step (two-TensorCore) grid heuristic.
    x3 = jax.random.normal(jax.random.PRNGKey(2), (4096, state_dim), dtype=jnp.float32)
    out3 = jax.block_until_ready(policy_forward(x3, w1, b1, w2, b2, max_action))
    ref3 = _reference(x3, w1, b1, w2, b2, max_action)
    assert out3.shape == (4096, action_dim)
    assert jnp.allclose(out3, ref3, atol=1e-4, rtol=1e-4)

    # 4) Optional bf16 input/weight path (f32 accumulation), looser tolerance.
    out4 = jax.block_until_ready(
        policy_forward(x3, w1, b1, w2, b2, max_action, use_bf16=True))
    assert out4.shape == (4096, action_dim)
    assert jnp.allclose(out4, ref3, atol=3e-2, rtol=3e-2)

    print("KERNEL_OK")
</pallas_src>

<mosaic_0001>
module attributes {stable_mosaic.version = 11 : i64} {
  func.func @_policy_kernel(%arg0: i32, %arg1: memref<1xf32, #tpu.memory_space<smem>>, %arg2: memref<1x256xf32, #tpu.memory_space<vmem>>, %arg3: memref<256x512xf32, #tpu.memory_space<vmem>>, %arg4: memref<1x512xf32, #tpu.memory_space<vmem>>, %arg5: memref<512x128xf32, #tpu.memory_space<vmem>>, %arg6: memref<1x128xf32, #tpu.memory_space<vmem>>, %arg7: memref<1x128xf32, #tpu.memory_space<vmem>>) attributes {dimension_semantics = [#tpu.dimension_semantics<parallel>], iteration_bounds = array<i64: 1>, scalar_prefetch = 0 : i64, scratch_operands = 0 : i64, tpu.core_type = #tpu.core_type<tc>, window_params = [{transform_indices = @transform_0, window_bounds = array<i64: 1>}, {transform_indices = @transform_1, window_bounds = array<i64: 1, 256>}, {pipeline_mode = #tpu.pipeline_mode<synchronous>, transform_indices = @transform_2, window_bounds = array<i64: 256, 512>}, {pipeline_mode = #tpu.pipeline_mode<synchronous>, transform_indices = @transform_3, window_bounds = array<i64: 1, 512>}, {pipeline_mode = #tpu.pipeline_mode<synchronous>, transform_indices = @transform_4, window_bounds = array<i64: 512, 128>}, {pipeline_mode = #tpu.pipeline_mode<synchronous>, transform_indices = @transform_5, window_bounds = array<i64: 1, 128>}, {transform_indices = @transform_6, window_bounds = array<i64: 1, 128>}]} {
    %c0 = arith.constant 0 : index
    %0 = memref.load %arg1[%c0] : memref<1xf32, #tpu.memory_space<smem>>
    %c0_0 = arith.constant 0 : index
    %c0_1 = arith.constant 0 : index
    %1 = vector.load %arg3[%c0_0, %c0_1] : memref<256x512xf32, #tpu.memory_space<vmem>>, vector<256x512xf32>
    %c0_2 = arith.constant 0 : index
    %c0_3 = arith.constant 0 : index
    %2 = vector.load %arg5[%c0_2, %c0_3] : memref<512x128xf32, #tpu.memory_space<vmem>>, vector<512x128xf32>
    %c0_4 = arith.constant 0 : index
    %c0_5 = arith.constant 0 : index
    %3 = vector.load %arg2[%c0_4, %c0_5] : memref<1x256xf32, #tpu.memory_space<vmem>>, vector<1x256xf32>
    %cst = arith.constant dense<0.000000e+00> : vector<1x512xf32>
    %4 = tpu.matmul %3, %1, %cst {dimension_numbers = #tpu.dot_dimension_numbers<[1], [0], [0], [1], [0, 0, 1, 1], [], []>} : vector<1x256xf32>, vector<256x512xf32>, vector<1x512xf32> -> vector<1x512xf32>
    %c0_6 = arith.constant 0 : index
    %c0_7 = arith.constant 0 : index
    %5 = vector.load %arg4[%c0_6, %c0_7] : memref<1x512xf32, #tpu.memory_space<vmem>>, vector<1x512xf32>
    %6 = arith.addf %4, %5 : vector<1x512xf32>
    %cst_8 = arith.constant 0.000000e+00 : f32
    %7 = vector.broadcast %cst_8 : f32 to vector<1x512xf32>
    %8 = arith.maximumf %6, %7 : vector<1x512xf32>
    %cst_9 = arith.constant dense<0.000000e+00> : vector<1x128xf32>
    %9 = tpu.matmul %8, %2, %cst_9 {dimension_numbers = #tpu.dot_dimension_numbers<[1], [0], [0], [1], [0, 0, 1, 1], [], []>} : vector<1x512xf32>, vector<512x128xf32>, vector<1x128xf32> -> vector<1x128xf32>
    %c0_10 = arith.constant 0 : index
    %c0_11 = arith.constant 0 : index
    %10 = vector.load %arg6[%c0_10, %c0_11] : memref<1x128xf32, #tpu.memory_space<vmem>>, vector<1x128xf32>
    %11 = arith.addf %9, %10 : vector<1x128xf32>
    %12 = math.tanh %11 : vector<1x128xf32>
    %13 = vector.broadcast %0 : f32 to vector<1x128xf32>
    %14 = arith.mulf %13, %12 : vector<1x128xf32>
    %c0_12 = arith.constant 0 : index
    %c0_13 = arith.constant 0 : index
    %15 = vector.load %arg7[%c0_12, %c0_13] : memref<1x128xf32, #tpu.memory_space<vmem>>, vector<1x128xf32>
    tpu.vector_store %arg7[%c0_12, %c0_13], %14 {strides = array<i32>} : memref<1x128xf32, #tpu.memory_space<vmem>>, vector<1x128xf32>,
    return
  }
  func.func @transform_0(%arg0: i32) -> i32 {
    %c0_i32 = arith.constant 0 : i32
    %c0_i32_0 = arith.constant 0 : i32
    return %c0_i32 : i32
  }
  func.func @transform_1(%arg0: i32) -> (i32, i32) {
    %c0_i32 = arith.constant 0 : i32
    %c0_i32_0 = arith.constant 0 : i32
    return %arg0, %c0_i32 : i32, i32
  }
  func.func @transform_2(%arg0: i32) -> (i32, i32) {
    %c0_i32 = arith.constant 0 : i32
    %c0_i32_0 = arith.constant 0 : i32
    %c0_i32_1 = arith.constant 0 : i32
    return %c0_i32, %c0_i32_0 : i32, i32
  }
  func.func @transform_3(%arg0: i32) -> (i32, i32) {
    %c0_i32 = arith.constant 0 : i32
    %c0_i32_0 = arith.constant 0 : i32
    %c0_i32_1 = arith.constant 0 : i32
    return %c0_i32, %c0_i32_0 : i32, i32
  }
  func.func @transform_4(%arg0: i32) -> (i32, i32) {
    %c0_i32 = arith.constant 0 : i32
    %c0_i32_0 = arith.constant 0 : i32
    %c0_i32_1 = arith.constant 0 : i32
    return %c0_i32, %c0_i32_0 : i32, i32
  }
  func.func @transform_5(%arg0: i32) -> (i32, i32) {
    %c0_i32 = arith.constant 0 : i32
    %c0_i32_0 = arith.constant 0 : i32
    %c0_i32_1 = arith.constant 0 : i32
    return %c0_i32, %c0_i32_0 : i32, i32
  }
  func.func @transform_6(%arg0: i32) -> (i32, i32) {
    %c0_i32 = arith.constant 0 : i32
    %c0_i32_0 = arith.constant 0 : i32
    return %arg0, %c0_i32 : i32, i32
  }
}

</mosaic_0001>

<bundles_post_ra>
// kernel: tpu_custom_call.1
= control target key start
LH: loop header
LB: loop body
LE: loop exit
PB: predicated region body
PF: predicated region fallthrough
CT: control target
= control target key end

     0   :  { %12 = vsyncpa [#allocation4], 0  ;;  %s1038_s0 = inlined_call_operand.<no memory space> [shape: f32[1], index: 0, kind: input, shape index: {}]   ;;  %s1039_s1 = inlined_call_operand.vmem [shape: f32[1,256], index: 1, kind: input, shape index: {}]   ;;  %s1040_s2 = inlined_call_operand.hbm [shape: f32[256,512], index: 2, kind: input, shape index: {}]   ;;  %s1041_s3 = inlined_call_operand.vmem [shape: f32[1,512], index: 3, kind: input, shape index: {}]   ;;  %s1042_s4 = inlined_call_operand.hbm [shape: f32[512,128], index: 4, kind: input, shape index: {}]   ;;  %s1043_s5 = inlined_call_operand.vmem [shape: f32[1,128], index: 5, kind: input, shape index: {}]   ;;  %s1044_s6 = inlined_call_operand.hbm [shape: f32[1,128], index: 6, kind: output, shape index: {}]  }
   0x1   :  { %13 = vsyncpa [#allocation7], 0 }
   0x2   :  { %14 = vsyncpa [#allocation5], 0  ;;  %s930_s21 = smov [#allocation3]   ;;  %s858_s25 = scalar_lea.hbm %s1040_s2, 16384 }
   0x3   :  { %s24_s22 = sshll.u32 %s930_s21, 4  ;;  %p859_p0 = scmp.ne.s32.totalorder %s1040_s2, %s858_s25  ;;  %s25_s22 = int_to_ptr.vmem [resolvable:$true] %s24_s22 }
   0x4   :  { %p862_p1 = scmp.lt.u32.totalorder %s858_s25, %s1040_s2 }
   0x6   :  { %p864_p2 = pnand %p862_p1, %p859_p0 }
   0x8   :  { %867 = shalt.err (!%p864_p2)
}
   0x9   :  { %s868_s30 = scalar_lea.vmem %s25_s22, 16384  ;;  %p873_p4 = scmp.lt.s32.totalorder %s25_s22, %s25_s22 }
   0xa   :  { %p869_p3 = scmp.ne.s32.totalorder %s25_s22, %s868_s30  ;;  %p874_p5 = scmp.lt.s32.totalorder %s868_s30, %s868_s30 }
   0xc   :  { %p875_p6 = por %p874_p5, %p873_p4 }
   0xe   :  { %p876_p7 = pnand %p875_p6, %p869_p3 }
  0x10   :  { %879 = shalt.err (!%p876_p7)
}
  0x11   :  { %s931_s7 = smov 512   ;;  %s932_s8 = smov 32  }
  0x12   :  { %30 = dma.hbm_to_vmem [thread:$0]  %s1040_s2, 16384, %s25_s22, [#allocation4], %s931_s7, %s931_s7, %s932_s8  }
  0x13   :  { %s933_s11 = smov [#allocation6]   ;;  %s880_s15 = scalar_lea.hbm %s1042_s4, 8192 }
  0x14   :  { %s38_s12 = sshll.u32 %s933_s11, 4  ;;  %p881_p8 = scmp.ne.s32.totalorder %s1042_s4, %s880_s15  ;;  %s39_s12 = int_to_ptr.vmem [resolvable:$true] %s38_s12 }
  0x15   :  { %p884_p9 = scmp.lt.u32.totalorder %s880_s15, %s1042_s4 }
  0x17   :  { %p886_p10 = pnand %p884_p9, %p881_p8 }
  0x19   :  { %889 = shalt.err (!%p886_p10)
}
  0x1a   :  { %s890_s20 = scalar_lea.vmem %s39_s12, 8192  ;;  %p895_p12 = scmp.lt.s32.totalorder %s39_s12, %s39_s12 }
  0x1b   :  { %p891_p11 = scmp.ne.s32.totalorder %s39_s12, %s890_s20  ;;  %p896_p13 = scmp.lt.s32.totalorder %s890_s20, %s890_s20 }
  0x1d   :  { %p897_p0 = por %p896_p13, %p895_p12 }
  0x1f   :  { %p898_p1 = pnand %p897_p0, %p891_p11 }
  0x21   :  { %901 = shalt.err (!%p898_p1)
}
  0x22   :  { %s934_s2 = smov 128   ;;  %s935_s21 = smov 8  }
  0x23   :  { %44 = dma.hbm_to_vmem [thread:$0]  %s1042_s4, 8192, %s39_s12, [#allocation7], %s934_s2, %s934_s2, %s935_s21  }
  0x24   :  { %924 = dma.done.wait [#allocation4], 16384  }
  0x25   :  { %925 = vsyncadd [#allocation4], 4294950912 }
  0x26   :  { %926 = dma.done.wait [#allocation7], 8192  }
  0x27   :  { %927 = vsyncadd [#allocation7], 4294959104  ;;  %v55_v0 = vld [vmem:[#allocation3 + $0x8] sm:$0xff]  ;;  %v57_v2 = vld [vmem:[#allocation3 + $0x18] sm:$0xff]  ;;  %s936_s29 = smov [#allocation8]  }
  0x28   :  { %v59_v1 = vld [vmem:[#allocation3 + $0x28] sm:$0xff]  ;;  %v61_v4 = vld [vmem:[#allocation3 + $0x38] sm:$0xff]  ;;  %v54_v5 = vld [vmem:[#allocation3] sm:$0xff]  ;;  %s577_s30 = sshll.u32 %s936_s29, 4  ;;  %s578_s30 = int_to_ptr.vmem [resolvable:$true] %s577_s30 }
  0x29   :  { %v657_v3 = vpack.c.bf16 %v59_v1, %v55_v0  ;;  %v58_v6 = vld [vmem:[#allocation3 + $0x20] sm:$0xff]  ;;  %v721_v7 = vpack.c.bf16 %v61_v4, %v57_v2  ;;  %v56_v9 = vld [vmem:[#allocation3 + $0x10] sm:$0xff]  ;;  %v63_v11 = vld [vmem:[#allocation3 + $0x48] sm:$0xff]  ;;  %s902_s7 = scalar_lea.vmem %s578_s30, 16  ;;  %p907_p3 = scmp.lt.s32.totalorder %s578_s30, %s578_s30 }
  0x2a   :  { %v659_v8 = vpack.c.bf16 %v58_v6, %v54_v5  ;;  %v60_v10 = vld [vmem:[#allocation3 + $0x30] sm:$0xff]  ;;  %v67_v13 = vld [vmem:[#allocation3 + $0x68] sm:$0xff]  ;;  %v65_v14 = vld [vmem:[#allocation3 + $0x58] sm:$0xff]  ;;  %p903_p2 = scmp.ne.s32.totalorder %s578_s30, %s902_s7 }
  0x2b   :  { %658 = vmatprep.subr.bf16.mxu0 %v657_v3  ;;  %v723_v12 = vpack.c.bf16 %v60_v10, %v56_v9  ;;  %v69_v15 = vld [vmem:[#allocation3 + $0x78] sm:$0xff]  ;;  %722 = vmatprep.subr.bf16.mxu1 %v721_v7  ;;  %v661_v16 = vpack.c.bf16 %v67_v13, %v63_v11  ;;  %v62_v18 = vld [vmem:[#allocation3 + $0x40] sm:$0xff]  ;;  %v64_v20 = vld [vmem:[#allocation3 + $0x50] sm:$0xff] }
  0x2c   :  { %660 = vmatpush1.bf16.msra.mxu0 %v659_v8  ;;  %v725_v17 = vpack.c.bf16 %v69_v15, %v65_v14  ;;  %v66_v19 = vld [vmem:[#allocation3 + $0x60] sm:$0xff]  ;;  %v68_v22 = vld [vmem:[#allocation3 + $0x70] sm:$0xff]  ;;  %v71_v23 = vld [vmem:[#allocation3 + $0x88] sm:$0xff] }
  0x2d   :  { %724 = vmatpush1.bf16.msra.mxu1 %v723_v12  ;;  %v663_v21 = vpack.c.bf16 %v66_v19, %v62_v18  ;;  %v75_v24 = vld [vmem:[#allocation3 + $0xa8] sm:$0xff]  ;;  %662 = vmatprep.subr.bf16.mxu0 %v661_v16  ;;  %v727_v25 = vpack.c.bf16 %v68_v22, %v64_v20  ;;  %v73_v27 = vld [vmem:[#allocation3 + $0x98] sm:$0xff]  ;;  %v70_v29 = vld [vmem:[#allocation3 + $0x80] sm:$0xff] }
  0x2e   :  { %726 = vmatprep.subr.bf16.mxu1 %v725_v17  ;;  %v665_v26 = vpack.c.bf16 %v75_v24, %v71_v23  ;;  %v77_v28 = vld [vmem:[#allocation3 + $0xb8] sm:$0xff]  ;;  %v74_v31 = vld [vmem:[#allocation3 + $0xa0] sm:$0xff]  ;;  %v72_v32 = vld [vmem:[#allocation3 + $0x90] sm:$0xff] }
  0x2f   :  { %v729_v30 = vpack.c.bf16 %v77_v28, %v73_v27  ;;  %v76_v33 = vld [vmem:[#allocation3 + $0xb0] sm:$0xff]  ;;  %v667_v34 = vpack.c.bf16 %v74_v31, %v70_v29  ;;  %v79_v35 = vld [vmem:[#allocation3 + $0xc8] sm:$0xff]  ;;  %v81_v37 = vld [vmem:[#allocation3 + $0xd8] sm:$0xff] }
  0x30   :  { %664 = vmatpush1.bf16.msra.mxu0 %v663_v21  ;;  %v83_v36 = vld [vmem:[#allocation3 + $0xe8] sm:$0xff]  ;;  %v731_v38 = vpack.c.bf16 %v76_v33, %v72_v32  ;;  %v85_v40 = vld [vmem:[#allocation3 + $0xf8] sm:$0xff]  ;;  %v78_v41 = vld [vmem:[#allocation3 + $0xc0] sm:$0xff] }
  0x31   :  { %728 = vmatpush1.bf16.msra.mxu1 %v727_v25  ;;  %666 = vmatprep.subr.bf16.mxu0 %v665_v26  ;;  %v669_v39 = vpack.c.bf16 %v83_v36, %v79_v35  ;;  %v82_v42 = vld [vmem:[#allocation3 + $0xe0] sm:$0xff]  ;;  %v733_v43 = vpack.c.bf16 %v85_v40, %v81_v37  ;;  %v80_v44 = vld [vmem:[#allocation3 + $0xd0] sm:$0xff]  ;;  %v87_v46 = vld [vmem:[#allocation3 + $0x108] sm:$0xff] }
  0x32   :  { %730 = vmatprep.subr.bf16.mxu1 %v729_v30  ;;  %v84_v45 = vld [vmem:[#allocation3 + $0xf0] sm:$0xff]  ;;  %v91_v47 = vld [vmem:[#allocation3 + $0x128] sm:$0xff]  ;;  %v89_v48 = vld [vmem:[#allocation3 + $0x118] sm:$0xff]  ;;  %v671_v50 = vpack.c.bf16 %v82_v42, %v78_v41 }
  0x33   :  { %v93_v49 = vld [vmem:[#allocation3 + $0x138] sm:$0xff]  ;;  %v735_v51 = vpack.c.bf16 %v84_v45, %v80_v44  ;;  %v673_v52 = vpack.c.bf16 %v91_v47, %v87_v46  ;;  %v86_v53 = vld [vmem:[#allocation3 + $0x100] sm:$0xff]  ;;  %v88_v55 = vld [vmem:[#allocation3 + $0x110] sm:$0xff]  ;;  %v249_v46 = vlaneseq }
  0x34   :  { %668 = vmatpush1.bf16.msra.mxu0 %v667_v34  ;;  %v90_v54 = vld [vmem:[#allocation3 + $0x120] sm:$0xff]  ;;  %v737_v56 = vpack.c.bf16 %v93_v49, %v89_v48  ;;  %v92_v57 = vld [vmem:[#allocation3 + $0x130] sm:$0xff]  ;;  %v95_v58 = vld [vmem:[#allocation3 + $0x148] sm:$0xff] }
  0x35   :  { %732 = vmatpush1.bf16.msra.mxu1 %v731_v38  ;;  %670 = vmatprep.subr.bf16.mxu0 %v669_v39  ;;  %v99_v59 = vld [vmem:[#allocation3 + $0x168] sm:$0xff]  ;;  %v97_v60 = vld [vmem:[#allocation3 + $0x158] sm:$0xff]  ;;  %v675_v62 = vpack.c.bf16 %v90_v54, %v86_v53  ;;  %v739_v63 = vpack.c.bf16 %v92_v57, %v88_v55  ;;  %v94_v1 = vld [vmem:[#allocation3 + $0x140] sm:$0xff] }
  0x36   :  { %734 = vmatprep.subr.bf16.mxu1 %v733_v43  ;;  %v101_v61 = vld [vmem:[#allocation3 + $0x178] sm:$0xff]  ;;  %v677_v0 = vpack.c.bf16 %v99_v59, %v95_v58  ;;  %v98_v2 = vld [vmem:[#allocation3 + $0x160] sm:$0xff]  ;;  %v96_v3 = vld [vmem:[#allocation3 + $0x150] sm:$0xff]  ;;  %v996_v59 = vshrl.u32 %v249_v46, 7 }
  0x37   :  { %v741_v4 = vpack.c.bf16 %v101_v61, %v97_v60  ;;  %v100_v5 = vld [vmem:[#allocation3 + $0x170] sm:$0xff]  ;;  %v103_v6 = vld [vmem:[#allocation3 + $0x188] sm:$0xff]  ;;  %v105_v8 = vld [vmem:[#allocation3 + $0x198] sm:$0xff]  ;;  %v679_v10 = vpack.c.bf16 %v98_v2, %v94_v1 }
  0x38   :  { %672 = vmatpush1.bf16.msra.mxu0 %v671_v50  ;;  %v107_v7 = vld [vmem:[#allocation3 + $0x1a8] sm:$0xff]  ;;  %v109_v9 = vld [vmem:[#allocation3 + $0x1b8] sm:$0xff]  ;;  %v743_v11 = vpack.c.bf16 %v100_v5, %v96_v3  ;;  %v102_v13 = vld [vmem:[#allocation3 + $0x180] sm:$0xff] }
  0x39   :  { %736 = vmatpush1.bf16.msra.mxu1 %v735_v51  ;;  %674 = vmatprep.subr.bf16.mxu0 %v673_v52  ;;  %v681_v12 = vpack.c.bf16 %v107_v7, %v103_v6  ;;  %v106_v14 = vld [vmem:[#allocation3 + $0x1a0] sm:$0xff]  ;;  %v104_v15 = vld [vmem:[#allocation3 + $0x190] sm:$0xff]  ;;  %v745_v16 = vpack.c.bf16 %v109_v9, %v105_v8  ;;  %v111_v18 = vld [vmem:[#allocation3 + $0x1c8] sm:$0xff]  ;;  %v255_v8 = vsub.s32 1, %v996_v59 }
  0x3a   :  { %738 = vmatprep.subr.bf16.mxu1 %v737_v56  ;;  %v108_v17 = vld [vmem:[#allocation3 + $0x1b0] sm:$0xff]  ;;  %v115_v19 = vld [vmem:[#allocation3 + $0x1e8] sm:$0xff]  ;;  %v113_v20 = vld [vmem:[#allocation3 + $0x1d8] sm:$0xff]  ;;  %v683_v22 = vpack.c.bf16 %v106_v14, %v102_v13 }
  0x3b   :  { %v117_v21 = vld [vmem:[#allocation3 + $0x1f8] sm:$0xff]  ;;  %v747_v23 = vpack.c.bf16 %v108_v17, %v104_v15  ;;  %v685_v24 = vpack.c.bf16 %v115_v19, %v111_v18  ;;  %v110_v25 = vld [vmem:[#allocation3 + $0x1c0] sm:$0xff]  ;;  %v112_v27 = vld [vmem:[#allocation3 + $0x1d0] sm:$0xff] }
  0x3c   :  { %676 = vmatpush1.bf16.msra.mxu0 %v675_v62  ;;  %v114_v26 = vld [vmem:[#allocation3 + $0x1e0] sm:$0xff]  ;;  %v749_v28 = vpack.c.bf16 %v117_v21, %v113_v20  ;;  %v116_v29 = vld [vmem:[#allocation3 + $0x1f0] sm:$0xff]  ;;  %v119_v30 = vld [vmem:[#allocation3 + $0x208] sm:$0xff] }
  0x3d   :  { %740 = vmatpush1.bf16.msra.mxu1 %v739_v63  ;;  %678 = vmatprep.subr.bf16.mxu0 %v677_v0  ;;  %v123_v31 = vld [vmem:[#allocation3 + $0x228] sm:$0xff]  ;;  %v121_v32 = vld [vmem:[#allocation3 + $0x218] sm:$0xff]  ;;  %v687_v34 = vpack.c.bf16 %v114_v26, %v110_v25  ;;  %v751_v35 = vpack.c.bf16 %v116_v29, %v112_v27  ;;  %v118_v37 = vld [vmem:[#allocation3 + $0x200] sm:$0xff] }
  0x3e   :  { %742 = vmatprep.subr.bf16.mxu1 %v741_v4  ;;  %v125_v33 = vld [vmem:[#allocation3 + $0x238] sm:$0xff]  ;;  %v689_v36 = vpack.c.bf16 %v123_v31, %v119_v30  ;;  %v122_v38 = vld [vmem:[#allocation3 + $0x220] sm:$0xff]  ;;  %v120_v39 = vld [vmem:[#allocation3 + $0x210] sm:$0xff] }
  0x3f   :  { %v753_v40 = vpack.c.bf16 %v125_v33, %v121_v32  ;;  %v124_v41 = vld [vmem:[#allocation3 + $0x230] sm:$0xff]  ;;  %v127_v42 = vld [vmem:[#allocation3 + $0x248] sm:$0xff]  ;;  %v129_v44 = vld [vmem:[#allocation3 + $0x258] sm:$0xff]  ;;  %v691_v47 = vpack.c.bf16 %v122_v38, %v118_v37 }
  0x40   :  { %680 = vmatpush1.bf16.msra.mxu0 %v679_v10  ;;  %v131_v43 = vld [vmem:[#allocation3 + $0x268] sm:$0xff]  ;;  %v133_v45 = vld [vmem:[#allocation3 + $0x278] sm:$0xff]  ;;  %v755_v48 = vpack.c.bf16 %v124_v41, %v120_v39  ;;  %v126_v50 = vld [vmem:[#allocation3 + $0x240] sm:$0xff] }
  0x41   :  { %744 = vmatpush1.bf16.msra.mxu1 %v743_v11  ;;  %682 = vmatprep.subr.bf16.mxu0 %v681_v12  ;;  %v693_v49 = vpack.c.bf16 %v131_v43, %v127_v42  ;;  %v130_v51 = vld [vmem:[#allocation3 + $0x260] sm:$0xff]  ;;  %v128_v52 = vld [vmem:[#allocation3 + $0x250] sm:$0xff]  ;;  %v757_v53 = vpack.c.bf16 %v133_v45, %v129_v44  ;;  %v135_v55 = vld [vmem:[#allocation3 + $0x288] sm:$0xff] }
  0x42   :  { %746 = vmatprep.subr.bf16.mxu1 %v745_v16  ;;  %v132_v54 = vld [vmem:[#allocation3 + $0x270] sm:$0xff]  ;;  %v139_v56 = vld [vmem:[#allocation3 + $0x2a8] sm:$0xff]  ;;  %v137_v57 = vld [vmem:[#allocation3 + $0x298] sm:$0xff]  ;;  %v695_v60 = vpack.c.bf16 %v130_v51, %v126_v50 }
  0x43   :  { %v141_v58 = vld [vmem:[#allocation3 + $0x2b8] sm:$0xff]  ;;  %v759_v61 = vpack.c.bf16 %v132_v54, %v128_v52  ;;  %v697_v62 = vpack.c.bf16 %v139_v56, %v135_v55  ;;  %v134_v63 = vld [vmem:[#allocation3 + $0x280] sm:$0xff]  ;;  %v136_v1 = vld [vmem:[#allocation3 + $0x290] sm:$0xff] }
  0x44   :  { %684 = vmatpush1.bf16.msra.mxu0 %v683_v22  ;;  %v138_v0 = vld [vmem:[#allocation3 + $0x2a0] sm:$0xff]  ;;  %v761_v2 = vpack.c.bf16 %v141_v58, %v137_v57  ;;  %v140_v3 = vld [vmem:[#allocation3 + $0x2b0] sm:$0xff]  ;;  %v143_v4 = vld [vmem:[#allocation3 + $0x2c8] sm:$0xff] }
  0x45   :  { %748 = vmatpush1.bf16.msra.mxu1 %v747_v23  ;;  %686 = vmatprep.subr.bf16.mxu0 %v685_v24  ;;  %v147_v5 = vld [vmem:[#allocation3 + $0x2e8] sm:$0xff]  ;;  %v145_v6 = vld [vmem:[#allocation3 + $0x2d8] sm:$0xff]  ;;  %v699_v9 = vpack.c.bf16 %v138_v0, %v134_v63  ;;  %v142_v10 = vld [vmem:[#allocation3 + $0x2c0] sm:$0xff]  ;;  %v763_v11 = vpack.c.bf16 %v140_v3, %v136_v1 }
  0x46   :  { %750 = vmatprep.subr.bf16.mxu1 %v749_v28  ;;  %v149_v7 = vld [vmem:[#allocation3 + $0x2f8] sm:$0xff]  ;;  %v701_v12 = vpack.c.bf16 %v147_v5, %v143_v4  ;;  %v146_v13 = vld [vmem:[#allocation3 + $0x2e0] sm:$0xff]  ;;  %v144_v14 = vld [vmem:[#allocation3 + $0x2d0] sm:$0xff] }
  0x47   :  { %v148_v15 = vld [vmem:[#allocation3 + $0x2f0] sm:$0xff]  ;;  %v765_v16 = vpack.c.bf16 %v149_v7, %v145_v6  ;;  %v151_v17 = vld [vmem:[#allocation3 + $0x308] sm:$0xff]  ;;  %v1002_v19 = vld [vmem:[%s1039_s1] sm:$0x3]  ;;  %v703_v23 = vpack.c.bf16 %v146_v13, %v142_v10  ;;  %v251_v6 = vsub.s32 0, %v996_v59 }
  0x48   :  { %688 = vmatpush1.bf16.msra.mxu0 %v687_v34  ;;  %v155_v18 = vld [vmem:[#allocation3 + $0x328] sm:$0xff]  ;;  %v153_v20 = vld [vmem:[#allocation3 + $0x318] sm:$0xff]  ;;  %v256_v22 = vrot.slane %v1002_v19, %v255_v8  ;;  %v767_v24 = vpack.c.bf16 %v148_v15, %v144_v14  ;;  %v150_v26 = vld [vmem:[#allocation3 + $0x300] sm:$0xff] }
  0x49   :  { %752 = vmatpush1.bf16.msra.mxu1 %v751_v35  ;;  %690 = vmatprep.subr.bf16.mxu0 %v689_v36  ;;  %v157_v21 = vld [vmem:[#allocation3 + $0x338] sm:$0xff]  ;;  %v705_v25 = vpack.c.bf16 %v155_v18, %v151_v17  ;;  %v154_v27 = vld [vmem:[#allocation3 + $0x320] sm:$0xff]  ;;  %v152_v28 = vld [vmem:[#allocation3 + $0x310] sm:$0xff] }
  0x4a   :  { %754 = vmatprep.subr.bf16.mxu1 %v753_v40  ;;  %v769_v29 = vpack.c.bf16 %v157_v21, %v153_v20  ;;  %v156_v30 = vld [vmem:[#allocation3 + $0x330] sm:$0xff]  ;;  %v159_v31 = vld [vmem:[#allocation3 + $0x348] sm:$0xff]  ;;  %344 = vmatprep.mubr.f32.mxu0 %v256_v22  ;;  %v161_v33 = vld [vmem:[#allocation3 + $0x358] sm:$0xff]  ;;  %v707_v35 = vpack.c.bf16 %v154_v27, %v150_v26  ;;  %v252_v21 = vrot.slane %v1002_v19, %v251_v6 }
  0x4b   :  { %v163_v32 = vld [vmem:[#allocation3 + $0x368] sm:$0xff]  ;;  %v165_v34 = vld [vmem:[#allocation3 + $0x378] sm:$0xff]  ;;  %415 = vmatprep.mubr.f32.mxu1 %v256_v22  ;;  %v771_v36 = vpack.c.bf16 %v156_v30, %v152_v28  ;;  %v158_v38 = vld [vmem:[#allocation3 + $0x340] sm:$0xff] }
  0x4c   :  { %692 = vmatpush1.bf16.msra.mxu0 %v691_v47  ;;  %v709_v37 = vpack.c.bf16 %v163_v32, %v159_v31  ;;  %v162_v39 = vld [vmem:[#allocation3 + $0x360] sm:$0xff]  ;;  %v160_v40 = vld [vmem:[#allocation3 + $0x350] sm:$0xff]  ;;  %v773_v41 = vpack.c.bf16 %v165_v34, %v161_v33  ;;  %v167_v43 = vld [vmem:[#allocation3 + $0x388] sm:$0xff] }
  0x4d   :  { %756 = vmatpush1.bf16.msra.mxu1 %v755_v48  ;;  %694 = vmatprep.subr.bf16.mxu0 %v693_v49  ;;  %v164_v42 = vld [vmem:[#allocation3 + $0x370] sm:$0xff]  ;;  %v171_v44 = vld [vmem:[#allocation3 + $0x3a8] sm:$0xff]  ;;  %v169_v45 = vld [vmem:[#allocation3 + $0x398] sm:$0xff]  ;;  %v711_v47 = vpack.c.bf16 %v162_v39, %v158_v38 }
  0x4e   :  { %758 = vmatprep.subr.bf16.mxu1 %v757_v53  ;;  %v173_v46 = vld [vmem:[#allocation3 + $0x3b8] sm:$0xff]  ;;  %v775_v48 = vpack.c.bf16 %v164_v42, %v160_v40  ;;  %v713_v49 = vpack.c.bf16 %v171_v44, %v167_v43  ;;  %v166_v50 = vld [vmem:[#allocation3 + $0x380] sm:$0xff]  ;;  %v168_v52 = vld [vmem:[#allocation3 + $0x390] sm:$0xff] }
  0x4f   :  { %v170_v51 = vld [vmem:[#allocation3 + $0x3a0] sm:$0xff]  ;;  %v777_v53 = vpack.c.bf16 %v173_v46, %v169_v45  ;;  %v172_v54 = vld [vmem:[#allocation3 + $0x3b0] sm:$0xff]  ;;  %v175_v55 = vld [vmem:[#allocation3 + $0x3c8] sm:$0xff] }
  0x50   :  { %696 = vmatpush1.bf16.msra.mxu0 %v695_v60  ;;  %v179_v56 = vld [vmem:[#allocation3 + $0x3e8] sm:$0xff]  ;;  %v177_v57 = vld [vmem:[#allocation3 + $0x3d8] sm:$0xff]  ;;  %v715_v60 = vpack.c.bf16 %v170_v51, %v166_v50  ;;  %v174_v63 = vld [vmem:[#allocation3 + $0x3c0] sm:$0xff] }
  0x51   :  { %760 = vmatpush1.bf16.msra.mxu1 %v759_v61  ;;  %698 = vmatprep.subr.bf16.mxu0 %v697_v62  ;;  %v181_v58 = vld [vmem:[#allocation3 + $0x3f8] sm:$0xff]  ;;  %v779_v61 = vpack.c.bf16 %v172_v54, %v168_v52  ;;  %v717_v62 = vpack.c.bf16 %v179_v56, %v175_v55  ;;  %v178_v0 = vld [vmem:[#allocation3 + $0x3e0] sm:$0xff]  ;;  %v176_v1 = vld [vmem:[#allocation3 + $0x3d0] sm:$0xff] }
  0x52   :  { %762 = vmatprep.subr.bf16.mxu1 %v761_v2  ;;  %v781_v2 = vpack.c.bf16 %v181_v58, %v177_v57  ;;  %v180_v3 = vld [vmem:[#allocation3 + $0x3f0] sm:$0xff]  ;;  %v198_v4 = vld [vmem:[#allocation6 + $0x80] sm:$0xff]  ;;  %v199_v5 = vld [vmem:[#allocation6 + $0x88] sm:$0xff]  ;;  %v719_v10 = vpack.c.bf16 %v178_v0, %v174_v63 }
  0x53   :  { %v230_v7 = vld [vmem:[#allocation6 + $0x180] sm:$0xff]  ;;  %v183_v14 = vld [vmem:[#allocation6 + $0x8] sm:$0xff]  ;;  %v200_v18 = vld [vmem:[#allocation6 + $0x90] sm:$0xff] }
  0x54   :  { %700 = vmatpush1.bf16.msra.mxu0 %v699_v9  ;;  %v231_v9 = vld [vmem:[#allocation6 + $0x188] sm:$0xff]  ;;  %v182_v13 = vld [vmem:[#allocation6] sm:$0xff]  ;;  %v201_v20 = vld [vmem:[#allocation6 + $0x98] sm:$0xff] }
  0x55   :  { %764 = vmatpush1.bf16.msra.mxu1 %v763_v11  ;;  %702 = vmatprep.subr.bf16.mxu0 %v701_v12  ;;  %v783_v11 = vpack.c.bf16 %v180_v3, %v176_v1  ;;  %v785_v12 = vpack.c.bf16 %v199_v5, %v198_v4  ;;  %v214_v15 = vld [vmem:[#allocation6 + $0x100] sm:$0xff]  ;;  %v215_v17 = vld [vmem:[#allocation6 + $0x108] sm:$0xff]  ;;  %v232_v22 = vld [vmem:[#allocation6 + $0x190] sm:$0xff]  ;;  %v789_v26 = vpack.c.bf16 %v201_v20, %v200_v18 }
  0x56   :  { %766 = vmatprep.subr.bf16.mxu1 %v765_v16  ;;  %v817_v16 = vpack.c.bf16 %v231_v9, %v230_v7  ;;  %v184_v27 = vld [vmem:[#allocation6 + $0x10] sm:$0xff]  ;;  %v185_v28 = vld [vmem:[#allocation6 + $0x18] sm:$0xff]  ;;  %v202_v32 = vld [vmem:[#allocation6 + $0xa0] sm:$0xff] }
  0x57   :  { %v217_v31 = vld [vmem:[#allocation6 + $0x118] sm:$0xff]  ;;  %v203_v33 = vld [vmem:[#allocation6 + $0xa8] sm:$0xff]  ;;  %v234_v34 = vld [vmem:[#allocation6 + $0x1a0] sm:$0xff]  ;;  %v791_v19 = vpack.c.bf16 %v185_v28, %v184_v27 }
  0x58   :  { %704 = vmatpush1.bf16.msra.mxu0 %v703_v23  ;;  %v233_v23 = vld [vmem:[#allocation6 + $0x198] sm:$0xff]  ;;  %v186_v38 = vld [vmem:[#allocation6 + $0x20] sm:$0xff]  ;;  %v187_v39 = vld [vmem:[#allocation6 + $0x28] sm:$0xff] }
  0x59   :  { %768 = vmatpush1.bf16.msra.mxu1 %v767_v24  ;;  %706 = vmatprep.subr.bf16.mxu0 %v705_v25  ;;  %v787_v24 = vpack.c.bf16 %v183_v14, %v182_v13  ;;  %v819_v25 = vpack.c.bf16 %v215_v17, %v214_v15  ;;  %v821_v30 = vpack.c.bf16 %v233_v23, %v232_v22  ;;  %v218_v40 = vld [vmem:[#allocation6 + $0x120] sm:$0xff]  ;;  %v219_v42 = vld [vmem:[#allocation6 + $0x128] sm:$0xff]  ;;  %v204_v43 = vld [vmem:[#allocation6 + $0xb0] sm:$0xff] }
  0x5a   :  { %770 = vmatprep.subr.bf16.mxu1 %v769_v29  ;;  %v216_v29 = vld [vmem:[#allocation6 + $0x110] sm:$0xff]  ;;  %v205_v44 = vld [vmem:[#allocation6 + $0xb8] sm:$0xff]  ;;  %v206_v55 = vld [vmem:[#allocation6 + $0xc0] sm:$0xff] }
  0x5b   :  { %v236_v45 = vld [vmem:[#allocation6 + $0x1b0] sm:$0xff]  ;;  %v237_v46 = vld [vmem:[#allocation6 + $0x1b8] sm:$0xff]  ;;  %v207_v56 = vld [vmem:[#allocation6 + $0xc8] sm:$0xff] }
  0x5c   :  { %708 = vmatpush1.bf16.msra.mxu0 %v707_v35  ;;  %v235_v35 = vld [vmem:[#allocation6 + $0x1a8] sm:$0xff]  ;;  %v188_v50 = vld [vmem:[#allocation6 + $0x30] sm:$0xff]  ;;  %v189_v51 = vld [vmem:[#allocation6 + $0x38] sm:$0xff] }
  0x5d   :  { %772 = vmatpush1.bf16.msra.mxu1 %v771_v36  ;;  %710 = vmatprep.subr.bf16.mxu0 %v709_v37  ;;  %v823_v36 = vpack.c.bf16 %v217_v31, %v216_v29  ;;  %v793_v37 = vpack.c.bf16 %v203_v33, %v202_v32  ;;  %v220_v52 = vld [vmem:[#allocation6 + $0x130] sm:$0xff]  ;;  %v221_v54 = vld [vmem:[#allocation6 + $0x138] sm:$0xff]  ;;  %v238_v57 = vld [vmem:[#allocation6 + $0x1c0] sm:$0xff] }
  0x5e   :  { %774 = vmatprep.subr.bf16.mxu1 %v773_v41  ;;  %v825_v41 = vpack.c.bf16 %v235_v35, %v234_v34  ;;  %v239_v58 = vld [vmem:[#allocation6 + $0x1c8] sm:$0xff]  ;;  %v190_v63 = vld [vmem:[#allocation6 + $0x40] sm:$0xff]  ;;  %v208_v4 = vld [vmem:[#allocation6 + $0xd0] sm:$0xff] }
  0x5f   :  { %v191_v0 = vld [vmem:[#allocation6 + $0x48] sm:$0xff]  ;;  %v222_v1 = vld [vmem:[#allocation6 + $0x140] sm:$0xff]  ;;  %v209_v5 = vld [vmem:[#allocation6 + $0xd8] sm:$0xff] }
  0x60   :  { %712 = vmatpush1.bf16.msra.mxu0 %v711_v47  ;;  %v795_v47 = vpack.c.bf16 %v187_v39, %v186_v38  ;;  %v223_v3 = vld [vmem:[#allocation6 + $0x148] sm:$0xff]  ;;  %v240_v7 = vld [vmem:[#allocation6 + $0x1d0] sm:$0xff]  ;;  %v241_v9 = vld [vmem:[#allocation6 + $0x1d8] sm:$0xff] }
  0x61   :  { %776 = vmatpush1.bf16.msra.mxu1 %v775_v48  ;;  %714 = vmatprep.subr.bf16.mxu0 %v713_v49  ;;  %v827_v48 = vpack.c.bf16 %v219_v42, %v218_v40  ;;  %v797_v49 = vpack.c.bf16 %v205_v44, %v204_v43  ;;  %v192_v13 = vld [vmem:[#allocation6 + $0x50] sm:$0xff]  ;;  %v193_v14 = vld [vmem:[#allocation6 + $0x58] sm:$0xff]  ;;  %v210_v18 = vld [vmem:[#allocation6 + $0xe0] sm:$0xff] }
  0x62   :  { %778 = vmatprep.subr.bf16.mxu1 %v777_v53  ;;  %v829_v53 = vpack.c.bf16 %v237_v46, %v236_v45  ;;  %v224_v15 = vld [vmem:[#allocation6 + $0x150] sm:$0xff]  ;;  %v225_v17 = vld [vmem:[#allocation6 + $0x158] sm:$0xff]  ;;  %v211_v20 = vld [vmem:[#allocation6 + $0xe8] sm:$0xff]  ;;  %v807_v23 = vpack.c.bf16 %v193_v14, %v192_v13  ;;  %v270_v45 = vsub.s32 2, %v996_v59  ;;  %v274_v46 = vsub.s32 3, %v996_v59 }
  0x63   :  { %v243_v22 = vld [vmem:[#allocation6 + $0x1e8] sm:$0xff]  ;;  %v194_v27 = vld [vmem:[#allocation6 + $0x60] sm:$0xff]  ;;  %v212_v33 = vld [vmem:[#allocation6 + $0xf0] sm:$0xff] }
  0x64   :  { %716 = vmatpush1.bf16.msra.mxu0 %v715_v60  ;;  %v799_v60 = vpack.c.bf16 %v189_v51, %v188_v50  ;;  %v195_v28 = vld [vmem:[#allocation6 + $0x68] sm:$0xff]  ;;  %v226_v29 = vld [vmem:[#allocation6 + $0x160] sm:$0xff]  ;;  %v213_v34 = vld [vmem:[#allocation6 + $0xf8] sm:$0xff] }
  0x65   :  { %780 = vmatpush1.bf16.msra.mxu1 %v779_v61  ;;  %718 = vmatprep.subr.bf16.mxu0 %v717_v62  ;;  %v831_v61 = vpack.c.bf16 %v221_v54, %v220_v52  ;;  %v801_v62 = vpack.c.bf16 %v207_v56, %v206_v55  ;;  %v227_v31 = vld [vmem:[#allocation6 + $0x168] sm:$0xff]  ;;  %v244_v35 = vld [vmem:[#allocation6 + $0x1f0] sm:$0xff]  ;;  %v197_v38 = vld [vmem:[#allocation6 + $0x78] sm:$0xff] }
  0x66   :  { %782 = vmatprep.subr.bf16.mxu1 %v781_v2  ;;  %v833_v2 = vpack.c.bf16 %v239_v58, %v238_v57  ;;  %v843_v32 = vpack.c.bf16 %v227_v31, %v226_v29  ;;  %v229_v42 = vld [vmem:[#allocation6 + $0x178] sm:$0xff]  ;;  %v247_v44 = vld [vmem:[%s1041_s3] sm:$0xf] }
  0x67   :  { %v275_v50 = vrot.slane %v247_v44, %v274_v46 }
  0x68   :  { %720 = vmatpush1.bf16.msra.mxu0 %v719_v10  ;;  %v803_v10 = vpack.c.bf16 %v191_v0, %v190_v63 }
  0x69   :  { %784 = vmatpush1.bf16.msra.mxu1 %v783_v11  ;;  %786 = vmatprep.subr.bf16.mxu0 %v785_v12  ;;  %v835_v11 = vpack.c.bf16 %v223_v3, %v222_v1  ;;  %v805_v12 = vpack.c.bf16 %v209_v5, %v208_v4 }
  0x6a   :  { %818 = vmatprep.subr.bf16.mxu1 %v817_v16  ;;  %v837_v16 = vpack.c.bf16 %v241_v9, %v240_v7  ;;  %v568_v7 = vstv %s1038_s0 }
  0x6b   :  { %345 = vmatmul.mubr.f32.vlgmr.msra.gmra.mrb[0].mxu0 %v252_v21 }
  0x6c   :  { %416 = vmatmul.mubr.f32.vlgmr.msra.gmra.mrb[0].mxu1 %v252_v21  ;;  %788 = vmatpush3.bf16.msra.mxu0 %v787_v24  ;;  %v242_v21 = vld [vmem:[#allocation6 + $0x1e0] sm:$0xff]  ;;  %v839_v24 = vpack.c.bf16 %v225_v17, %v224_v15 }
  0x6d   :  { %820 = vmatpush3.bf16.msra.mxu1 %v819_v25  ;;  %790 = vmatprep.subr.bf16.mxu0 %v789_v26  ;;  %v809_v25 = vpack.c.bf16 %v211_v20, %v210_v18  ;;  %v841_v26 = vpack.c.bf16 %v243_v22, %v242_v21 }
  0x6e   :  { %822 = vmatprep.subr.bf16.mxu1 %v821_v30  ;;  %v811_v30 = vpack.c.bf16 %v195_v28, %v194_v27 }
  0x70   :  { %792 = vmatpush3.bf16.msra.mxu0 %v791_v19  ;;  %v813_v19 = vpack.c.bf16 %v213_v34, %v212_v33 }
  0x71   :  { %824 = vmatpush3.bf16.msra.mxu1 %v823_v36  ;;  %794 = vmatprep.subr.bf16.mxu0 %v793_v37  ;;  %v245_v36 = vld [vmem:[#allocation6 + $0x1f8] sm:$0xff]  ;;  %v196_v37 = vld [vmem:[#allocation6 + $0x70] sm:$0xff] }
  0x72   :  { %826 = vmatprep.subr.bf16.mxu1 %v825_v41  ;;  %v845_v39 = vpack.c.bf16 %v245_v36, %v244_v35  ;;  %v815_v40 = vpack.c.bf16 %v197_v38, %v196_v37  ;;  %v228_v41 = vld [vmem:[#allocation6 + $0x170] sm:$0xff] }
  0x73   :  { %v847_v43 = vpack.c.bf16 %v229_v42, %v228_v41 }
  0x74   :  { %796 = vmatpush3.bf16.msra.mxu0 %v795_v47  ;;  %v263_v47 = vrot.slane %v247_v44, %v251_v6 }
  0x75   :  { %828 = vmatpush3.bf16.msra.mxu1 %v827_v48  ;;  %798 = vmatprep.subr.bf16.mxu0 %v797_v49  ;;  %v271_v48 = vrot.slane %v247_v44, %v270_v45  ;;  %v267_v49 = vrot.slane %v247_v44, %v255_v8  ;;  %v426_v8 = vld [vmem:[%s1043_s5] sm:$0x1]  ;;  %s906_s5 = scalar_lea.vmem %s578_s30, 32 }
  0x76   :  { %830 = vmatprep.subr.bf16.mxu1 %v829_v53  ;;  %p908_p4 = scmp.lt.s32.totalorder %s906_s5, %s902_s7 }
  0x78   :  { %800 = vmatpush3.bf16.msra.mxu0 %v799_v60  ;;  %p909_p5 = por %p908_p4, %p907_p3 }
  0x79   :  { %832 = vmatpush3.bf16.msra.mxu1 %v831_v61  ;;  %802 = vmatprep.subr.bf16.mxu0 %v801_v62 }
  0x7a   :  { %834 = vmatprep.subr.bf16.mxu1 %v833_v2  ;;  %p910_p6 = pnand %p909_p5, %p903_p2 }
  0x7c   :  { %804 = vmatpush3.bf16.msra.mxu0 %v803_v10 }
  0x7d   :  { %836 = vmatpush3.bf16.msra.mxu1 %v835_v11  ;;  %806 = vmatprep.subr.bf16.mxu0 %v805_v12 }
  0x7e   :  { %838 = vmatprep.subr.bf16.mxu1 %v837_v16 }
  0x80   :  { %808 = vmatpush3.bf16.msra.mxu0 %v807_v23 }
  0x81   :  { %840 = vmatpush3.bf16.msra.mxu1 %v839_v24  ;;  %810 = vmatprep.subr.bf16.mxu0 %v809_v25 }
  0x82   :  { %842 = vmatprep.subr.bf16.mxu1 %v841_v26 }
  0x84   :  { %812 = vmatpush3.bf16.msra.mxu0 %v811_v30 }
  0x85   :  { %844 = vmatpush3.bf16.msra.mxu1 %v843_v32  ;;  %814 = vmatprep.subr.bf16.mxu0 %v813_v19 }
  0x86   :  { %846 = vmatprep.subr.bf16.mxu1 %v845_v39 }
  0x88   :  { %816 = vmatpush3.bf16.msra.mxu0 %v815_v40 }
  0x89   :  { %848 = vmatpush3.bf16.msra.mxu1 %v847_v43 }
 0x13e   :  { %v346_v51 = vpop.f32.mrb[0].mxu0 }
 0x13f   :  { %v347_v52 = vadd.f32 %v346_v51, %v263_v47  ;;  %v417_v53 = vpop.f32.mrb[0].mxu1  ;;  %v348_v54 = vpop.f32.mrb[1].mxu0 }
 0x140   :  { %v418_v55 = vadd.f32 %v417_v53, %v271_v48  ;;  %v349_v56 = vadd.f32 %v348_v54, %v267_v49  ;;  %v419_v57 = vpop.f32.mrb[1].mxu1 }
 0x141   :  { %v420_v58 = vadd.f32 %v419_v57, %v275_v50  ;;  %v422_v62 = vmax.f32 %v347_v52, 0.0 }
 0x142   :  { %v424_v60 = vmax.f32 %v418_v55, 0.0  ;;  %v423_v61 = vmax.f32 %v349_v56, 0.0 }
 0x143   :  { %v425_v63 = vmax.f32 %v420_v58, 0.0 }
 0x144   :  { %491 = vmatprep.mubr.f32.mxu0 %v423_v61 }
 0x145   :  { %561 = vmatprep.mubr.f32.mxu1 %v425_v63  ;;  %492 = vmatmul.mubr.f32.vlgmr.msra.gmra.mrb[2].mxu0 %v422_v62 }
 0x146   :  { %562 = vmatmul.mubr.f32.vlgmr.msra.gmra.mrb[2].mxu1 %v424_v60 }
 0x218   :  { %v619_v6 = vpop.f32.mrb[2].mxu0 }
 0x219   :  { %v654_v59 = vpop.f32.mrb[2].mxu1  ;;  %v620_v0 = vpop.f32.mrb[3].mxu0 }
 0x21a   :  { %v621_v1 = vadd.f32 %v620_v0, %v619_v6  ;;  %v655_v2 = vpop.f32.mrb[3].mxu1 }
 0x21b   :  { %v656_v3 = vadd.f32 %v655_v2, %v654_v59 }
 0x21c   :  { %v494_v4 = vadd.f32 %v621_v1, %v426_v8 }
 0x21e   :  { %v564_v5 = vadd.f32 %v656_v3, %v494_v4 }
 0x220   :  { %856 = vtanh.f32 %v564_v5 }
 0x22a   :  { %v857_v9 = vpop.eup %856 }
 0x22b   :  { %v569_v10 = vmul.f32 %v857_v9, %v568_v7 }
 0x22d   :  { %570 = vst [vmem:[#allocation8] sm:$0x1] %v569_v10 }
 0x22e   :  { %913 = shalt.err (!%p910_p6)
}
 0x22f   :  { %s914_s10 = scalar_lea.hbm %s1044_s6, 16 }
 0x230   :  { %p915_p7 = scmp.ne.s32.totalorder %s1044_s6, %s914_s10  ;;  %p918_p8 = scmp.lt.u32.totalorder %s914_s10, %s1044_s6 }
 0x232   :  { %p920_p9 = pnand %p918_p8, %p915_p7 }
 0x234   :  { %923 = shalt.err (!%p920_p9)
}
 0x235   :  { %580 = dma.vmem_to_hbm [thread:$0]  %s578_s30, 16, %s1044_s6, [#allocation5]  }
 0x236   :  { %928 = dma.done.wait [#allocation5], 16  }
 0x237   :  { %929 = vsyncadd [#allocation5], 4294967280 }
 0x238   :  { %584 = vsyncpa [#allocation4], 1 }
 0x239   :  { %585 = vsyncpa [#allocation7], 1 }
 0x23a   :  { %586 = vsyncpa [#allocation5], 1 }

</bundles_post_ra>
